<compile_context>
chip_gen: v5e
topology: v5e:2x2
jax: 0.10.0
libtpu: 0.0.40
codegen_flags: <defaults>
</compile_context>

<pallas_src>
import functools

import jax
import jax.numpy as jnp
from jax.experimental import pallas as pl
from jax.experimental.pallas import tpu as pltpu


NEG_SLOPE = 0.01  # nn.LeakyReLU() default negative_slope


# ---------------------------------------------------------------------------
# Kernels — feature-major (transposed) layout: rows of x live on the lane axis.
# ---------------------------------------------------------------------------
def _mlp_kernel_t(x_ref, w1_ref, b1_ref, w2_ref, b2_ref, o_ref):
    # x_ref: (num_in, t)   w1_ref: (layer_width, num_in)   b1_ref: (layer_width, 1)
    # hT = W1 @ xT + b1  -> (layer_width, t), f32 accumulation on the MXU.
    h = jnp.dot(w1_ref[...], x_ref[...], preferred_element_type=jnp.float32)
    h = h + b1_ref[...]
    # LeakyReLU (negative_slope = 0.01), kept in f32 on the VPU.
    h = jnp.where(h >= 0, h, NEG_SLOPE * h)
    # outT = W2 @ hT + b2 -> (num_out, t); lane-dense, unmasked stores.
    out = jnp.dot(w2_ref[...], h.astype(w2_ref.dtype),
                  preferred_element_type=jnp.float32)
    out = out + b2_ref[...]
    o_ref[...] = out.astype(o_ref.dtype)


def _mlp_kernel_t_masked(x_ref, w1_ref, b1_ref, w2_ref, b2_ref, mask_ref, o_ref):
    h = jnp.dot(w1_ref[...], x_ref[...], preferred_element_type=jnp.float32)
    h = h + b1_ref[...]
    h = jnp.where(h >= 0, h, NEG_SLOPE * h)
    out = jnp.dot(w2_ref[...], h.astype(w2_ref.dtype),
                  preferred_element_type=jnp.float32)
    out = out + b2_ref[...]
    # mask_ref: (1, t) or (num_out, t) int8; nonzero == keep (torch.where(mask, x, 0)).
    out = jnp.where(mask_ref[...] != 0, out, 0.0)
    o_ref[...] = out.astype(o_ref.dtype)


# ---------------------------------------------------------------------------
# VMEM / tiling helpers (real padded bytes, not logical bytes)
# ---------------------------------------------------------------------------
def _round_up(v, mult):
    return ((v + mult - 1) // mult) * mult


_SUBLANE = {4: 8, 2: 16, 1: 32}  # itemsize -> native sublane tile


def _padded_row_bytes(rows, itemsize):
    """Bytes per lane-column of a (rows, t) VMEM block, incl. sublane padding."""
    return _round_up(max(rows, 1), _SUBLANE.get(itemsize, 8)) * itemsize


def _padded_tile_bytes(rows, cols, itemsize):
    """Real VMEM bytes of a fully-resident (rows, cols) block (sublane+lane pad)."""
    return _padded_row_bytes(rows, itemsize) * _round_up(max(cols, 1), 128)


def _vmem_capacity_bytes():
    try:
        return int(pltpu.get_tpu_info().vmem_capacity_bytes)
    except Exception:
        return 64 << 20  # conservative (v7x-sized) fallback


# ---------------------------------------------------------------------------
# Wrapper
# ---------------------------------------------------------------------------
@functools.partial(jax.jit, static_argnames=("tile_m", "use_bf16"))
def basic_mlp_pallas(x, w1, b1, w2, b2, mask=None, *, tile_m=32768, use_bf16=False):
    """BasicMLP forward (num_hidden=1, activation='leakyrelu').

    x   : (..., num_in)
    w1  : (layer_width, num_in)   -- PyTorch nn.Linear orientation (out, in)
    b1  : (layer_width,)
    w2  : (num_out, layer_width)
    b2  : (num_out,)
    mask: optional, broadcastable to (..., num_out) (last dim 1 or num_out).
    use_bf16: stream x / W1 / W2 as bf16 (f32 accumulation, ~1e-2 tolerance).
    """
    num_in = x.shape[-1]
    layer_width, w1_in = w1.shape
    num_out, w2_in = w2.shape
    assert w1_in == num_in and w2_in == layer_width

    out_dtype = x.dtype
    compute_dtype = jnp.bfloat16 if use_bf16 else jnp.float32
    xb = jnp.dtype(compute_dtype).itemsize
    ob = jnp.dtype(out_dtype).itemsize

    lead_shape = x.shape[:-1]
    m = 1
    for d in lead_shape:
        m *= d

    has_mask = mask is not None
    mrows = 0
    mask_compact = False
    if has_mask:
        mask = jnp.asarray(mask)
        mask_compact = (mask.ndim == x.ndim and mask.shape[:-1] == lead_shape
                        and mask.shape[-1] in (1, num_out))
        mrows = int(mask.shape[-1]) if mask_compact else num_out

    # --- generation-aware VMEM budget (v7x 64 MiB vs v5e/v6e 128 MiB) ---------
    vmem_cap = _vmem_capacity_bytes()
    budget = min(int(vmem_cap * 0.8), vmem_cap - (8 << 20))  # ~51 MiB v7x / ~102 MiB v6e

    # Resident (constant index_map, double-buffered) weights + biases.
    weight_bytes = 2 * (_padded_tile_bytes(layer_width, num_in, xb)
                        + _padded_tile_bytes(num_out, layer_width, xb)
                        + _padded_tile_bytes(layer_width, 1, 4)
                        + _padded_tile_bytes(num_out, 1, 4))
    if weight_bytes > budget // 3:
        # TODO(synk): K-tiled fallback (grid axis over layer_width with an f32
        # accumulator scratch + pl.when init/finalize) for layer widths whose
        # weights do not stay VMEM-resident (matters on v7x's 64 MiB VMEM).
        raise ValueError(
            f"BasicMLP weights ({weight_bytes / 2**20:.1f} MiB padded) exceed the "
            f"VMEM-resident budget ({budget // 3 / 2**20:.1f} MiB); K-tiled "
            "fallback not implemented.")

    # Per-lane-column VMEM bytes: double-buffered streams + f32 intermediates.
    per_col = 2 * _padded_row_bytes(num_in, xb)        # x^T stream
    per_col += 2 * _padded_row_bytes(num_out, ob)      # out^T stream
    if has_mask:
        per_col += 2 * _padded_row_bytes(mrows, 1)     # mask^T stream (int8)
    per_col += _padded_row_bytes(layer_width, 4)       # h^T (f32)
    per_col += 2 * _padded_row_bytes(num_out, 4)       # f32 out before cast + temps

    t_budget = (budget - weight_bytes - (2 << 20)) // per_col
    t_budget = max(128, (t_budget // 128) * 128)
    t_cap = min(_round_up(tile_m, 128), t_budget)

    if m <= t_cap:
        # Whole problem in a single block (block dims equal the full array dims):
        # no forced multi-step split for small problems (1-TC chips).
        t, n_steps = max(m, 1), 1
    else:
        t = t_cap                     # multiple of 128 -> unmasked lane-dense stores
        n_steps = int(pl.cdiv(m, t))  # >= 2 steps; also feeds v7x's 2 TensorCores
    m_cols = n_steps * t
    pad_cols = m_cols - m

    # --- layout plumbing: transpose to feature-major; tail padding and the bf16
    #     cast are folded into this same XLA copy (no extra jnp.pad pass). -----
    x2d = x.reshape(m, num_in).astype(compute_dtype)
    if pad_cols:
        x2d = jnp.pad(x2d, ((0, pad_cols), (0, 0)))
    xT = x2d.T                                           # (num_in, m_cols)

    w1c = w1.astype(compute_dtype)
    w2c = w2.astype(compute_dtype)
    b1c = b1.reshape(layer_width, 1).astype(jnp.float32)
    b2c = b2.reshape(num_out, 1).astype(jnp.float32)

    x_spec = pl.BlockSpec((num_in, t), lambda i: (0, i))
    w1_spec = pl.BlockSpec((layer_width, num_in), lambda i: (0, 0))
    b1_spec = pl.BlockSpec((layer_width, 1), lambda i: (0, 0))
    w2_spec = pl.BlockSpec((num_out, layer_width), lambda i: (0, 0))
    b2_spec = pl.BlockSpec((num_out, 1), lambda i: (0, 0))
    out_spec = pl.BlockSpec((num_out, t), lambda i: (0, i))

    # Cost estimate from the actually-streamed (dense, transposed) bytes.
    flops = 2 * m_cols * (num_in * layer_width + layer_width * num_out)
    bytes_accessed = (m_cols * (num_in * xb + num_out * ob
                                + (mrows if has_mask else 0))
                      + (layer_width * num_in + num_out * layer_width) * xb
                      + (layer_width + num_out) * 4)
    cost = pl.CostEstimate(flops=flops, transcendentals=0,
                           bytes_accessed=bytes_accessed)

    if has_mask:
        if mask_compact:
            mask2d = mask.reshape(m, mrows)              # un-broadcast stream
        else:
            mask2d = jnp.broadcast_to(mask, lead_shape + (num_out,)).reshape(m, num_out)
        mask2d = (mask2d != 0).astype(jnp.int8)          # truthiness == torch.where
        if pad_cols:
            mask2d = jnp.pad(mask2d, ((0, pad_cols), (0, 0)))
        maskT = mask2d.T                                  # (mrows, m_cols) int8
        kernel = _mlp_kernel_t_masked
        in_specs = [x_spec, w1_spec, b1_spec, w2_spec, b2_spec,
                    pl.BlockSpec((mrows, t), lambda i: (0, i))]
        args = (xT, w1c, b1c, w2c, b2c, maskT)
    else:
        kernel = _mlp_kernel_t
        in_specs = [x_spec, w1_spec, b1_spec, w2_spec, b2_spec]
        args = (xT, w1c, b1c, w2c, b2c)

    out_t = pl.pallas_call(
        kernel,
        out_shape=jax.ShapeDtypeStruct((num_out, m_cols), out_dtype),
        grid_spec=pltpu.PrefetchScalarGridSpec(
            num_scalar_prefetch=0,
            grid=(n_steps,),
            in_specs=in_specs,
            out_specs=out_spec,
        ),
        compiler_params=pltpu.CompilerParams(
            # NOTE(v7x): if profiling shows only one TensorCore busy, switch this
            # axis to pltpu.CORE_PARALLEL (n_steps >= 2 whenever m > t_cap).
            dimension_semantics=("parallel",),
            vmem_limit_bytes=int(budget),
        ),
        cost_estimate=cost,
    )(*args)

    # Back to row-major (..., num_out); the slice drops the padded tail and fuses
    # with this single transpose copy.
    out2d = out_t[:, :m].T
    return out2d.reshape(lead_shape + (num_out,))


# ---------------------------------------------------------------------------
# Pure-JAX reference (PyTorch semantics, weights in (out, in) orientation)
# ---------------------------------------------------------------------------
def _reference(x, w1, b1, w2, b2, mask):
    h = x @ w1.T + b1
    h = jnp.where(h >= 0, h, NEG_SLOPE * h)
    out = h @ w2.T + b2
    if mask is None:
        return out
    return jnp.where(mask, out, jnp.zeros((), x.dtype))


if __name__ == "__main__":
    num_in, layer_width, num_out = 4, 32, 8

    key = jax.random.PRNGKey(0)
    k_x, k_w1, k_b1, k_w2, k_b2, k_m, k_x2, k_m2 = jax.random.split(key, 8)

    # Deterministic nn.Linear-style init, PyTorch orientation (out_features, in_features).
    bound1 = 1.0 / (num_in ** 0.5)
    w1 = jax.random.uniform(k_w1, (layer_width, num_in), jnp.float32, -bound1, bound1)
    b1 = jax.random.uniform(k_b1, (layer_width,), jnp.float32, -bound1, bound1)
    bound2 = 1.0 / (layer_width ** 0.5)
    w2 = jax.random.uniform(k_w2, (num_out, layer_width), jnp.float32, -bound2, bound2)
    b2 = jax.random.uniform(k_b2, (num_out,), jnp.float32, -bound2, bound2)

    # --- small case (single-block path): batch=2, seq=8 ----------------------
    batch, seq = 2, 8
    x = jax.random.normal(k_x, (batch, seq, num_in), dtype=jnp.float32)
    mask = jax.random.bernoulli(k_m, 0.7, (batch, seq, num_out))

    out = jax.block_until_ready(basic_mlp_pallas(x, w1, b1, w2, b2, mask))
    ref = _reference(x, w1, b1, w2, b2, mask)
    assert out.shape == (batch, seq, num_out)
    assert jnp.allclose(out, ref, atol=1e-4, rtol=1e-4), "masked f32 mismatch"

    out_nm = jax.block_until_ready(basic_mlp_pallas(x, w1, b1, w2, b2))
    ref_nm = _reference(x, w1, b1, w2, b2, None)
    assert jnp.allclose(out_nm, ref_nm, atol=1e-4, rtol=1e-4), "unmasked f32 mismatch"

    # bf16 streaming (f32 accumulation) — looser tolerance.
    out_bf = jax.block_until_ready(
        basic_mlp_pallas(x, w1, b1, w2, b2, mask, use_bf16=True))
    assert jnp.allclose(out_bf, ref, atol=5e-2, rtol=5e-2), "masked bf16 mismatch"

    # --- multi-step grid + padded ragged tail + per-row (..., 1) mask --------
    batch2, seq2 = 8, 125                      # m = 1000 rows, tile 256 -> 4 steps
    x_big = jax.random.normal(k_x2, (batch2, seq2, num_in), dtype=jnp.float32)
    mask_row = jax.random.bernoulli(k_m2, 0.5, (batch2, seq2, 1))
    out_big = jax.block_until_ready(
        basic_mlp_pallas(x_big, w1, b1, w2, b2, mask_row, tile_m=256))
    ref_big = _reference(x_big, w1, b1, w2, b2, mask_row)
    assert out_big.shape == (batch2, seq2, num_out)
    assert jnp.allclose(out_big, ref_big, atol=1e-4, rtol=1e-4), "multi-step mismatch"

    print("KERNEL_OK")
</pallas_src>

<mosaic_0001>
module attributes {stable_mosaic.version = 11 : i64} {
  func.func @_mlp_kernel_t_masked(%arg0: i32, %arg1: memref<4x16xf32, #tpu.memory_space<vmem>>, %arg2: memref<32x4xf32, #tpu.memory_space<vmem>>, %arg3: memref<32x1xf32, #tpu.memory_space<vmem>>, %arg4: memref<8x32xf32, #tpu.memory_space<vmem>>, %arg5: memref<8x1xf32, #tpu.memory_space<vmem>>, %arg6: memref<8x16xi8, #tpu.memory_space<vmem>>, %arg7: memref<8x16xf32, #tpu.memory_space<vmem>>) attributes {dimension_semantics = [#tpu.dimension_semantics<parallel>], iteration_bounds = array<i64: 1>, scalar_prefetch = 0 : i64, scratch_operands = 0 : i64, tpu.core_type = #tpu.core_type<tc>, window_params = [{transform_indices = @transform_0, window_bounds = array<i64: 4, 16>}, {pipeline_mode = #tpu.pipeline_mode<synchronous>, transform_indices = @transform_1, window_bounds = array<i64: 32, 4>}, {pipeline_mode = #tpu.pipeline_mode<synchronous>, transform_indices = @transform_2, window_bounds = array<i64: 32, 1>}, {pipeline_mode = #tpu.pipeline_mode<synchronous>, transform_indices = @transform_3, window_bounds = array<i64: 8, 32>}, {pipeline_mode = #tpu.pipeline_mode<synchronous>, transform_indices = @transform_4, window_bounds = array<i64: 8, 1>}, {transform_indices = @transform_5, window_bounds = array<i64: 8, 16>}, {transform_indices = @transform_6, window_bounds = array<i64: 8, 16>}]} {
    %c0 = arith.constant 0 : index
    %c0_0 = arith.constant 0 : index
    %0 = vector.load %arg2[%c0, %c0_0] : memref<32x4xf32, #tpu.memory_space<vmem>>, vector<32x4xf32>
    %c0_1 = arith.constant 0 : index
    %c0_2 = arith.constant 0 : index
    %1 = vector.load %arg1[%c0_1, %c0_2] : memref<4x16xf32, #tpu.memory_space<vmem>>, vector<4x16xf32>
    %cst = arith.constant dense<0.000000e+00> : vector<32x16xf32>
    %2 = tpu.matmul %0, %1, %cst {dimension_numbers = #tpu.dot_dimension_numbers<[1], [0], [0], [1], [0, 0, 1, 1], [], []>} : vector<32x4xf32>, vector<4x16xf32>, vector<32x16xf32> -> vector<32x16xf32>
    %c0_3 = arith.constant 0 : index
    %c0_4 = arith.constant 0 : index
    %3 = vector.load %arg3[%c0_3, %c0_4] : memref<32x1xf32, #tpu.memory_space<vmem>>, vector<32x1xf32>
    %4 = vector.broadcast %3 : vector<32x1xf32> to vector<32x16xf32>
    %5 = arith.addf %2, %4 : vector<32x16xf32>
    %cst_5 = arith.constant 0.000000e+00 : f32
    %6 = vector.broadcast %cst_5 : f32 to vector<32x16xf32>
    %7 = arith.cmpf oge, %5, %6 : vector<32x16xf32>
    %cst_6 = arith.constant 0.00999999977 : f32
    %8 = vector.broadcast %cst_6 : f32 to vector<32x16xf32>
    %9 = arith.mulf %8, %5 : vector<32x16xf32>
    %10 = arith.select %7, %5, %9 : vector<32x16xi1>, vector<32x16xf32>
    %c0_7 = arith.constant 0 : index
    %c0_8 = arith.constant 0 : index
    %11 = vector.load %arg4[%c0_7, %c0_8] : memref<8x32xf32, #tpu.memory_space<vmem>>, vector<8x32xf32>
    %cst_9 = arith.constant dense<0.000000e+00> : vector<8x16xf32>
    %12 = tpu.matmul %11, %10, %cst_9 {dimension_numbers = #tpu.dot_dimension_numbers<[1], [0], [0], [1], [0, 0, 1, 1], [], []>} : vector<8x32xf32>, vector<32x16xf32>, vector<8x16xf32> -> vector<8x16xf32>
    %c0_10 = arith.constant 0 : index
    %c0_11 = arith.constant 0 : index
    %13 = vector.load %arg5[%c0_10, %c0_11] : memref<8x1xf32, #tpu.memory_space<vmem>>, vector<8x1xf32>
    %14 = vector.broadcast %13 : vector<8x1xf32> to vector<8x16xf32>
    %15 = arith.addf %12, %14 : vector<8x16xf32>
    %c0_12 = arith.constant 0 : index
    %c0_13 = arith.constant 0 : index
    %16 = vector.load %arg6[%c0_12, %c0_13] : memref<8x16xi8, #tpu.memory_space<vmem>>, vector<8x16xi8>
    %c0_i8 = arith.constant 0 : i8
    %17 = vector.broadcast %c0_i8 : i8 to vector<8x16xi8>
    %18 = arith.cmpi ne, %16, %17 : vector<8x16xi8>
    %cst_14 = arith.constant 0.000000e+00 : f32
    %19 = vector.broadcast %cst_14 : f32 to vector<8x16xf32>
    %20 = arith.select %18, %15, %19 : vector<8x16xi1>, vector<8x16xf32>
    %c0_15 = arith.constant 0 : index
    %c0_16 = arith.constant 0 : index
    %21 = vector.load %arg7[%c0_15, %c0_16] : memref<8x16xf32, #tpu.memory_space<vmem>>, vector<8x16xf32>
    tpu.vector_store %arg7[%c0_15, %c0_16], %20 {strides = array<i32>} : memref<8x16xf32, #tpu.memory_space<vmem>>, vector<8x16xf32>,
    return
  }
  func.func @transform_0(%arg0: i32) -> (i32, i32) {
    %c0_i32 = arith.constant 0 : i32
    %c0_i32_0 = arith.constant 0 : i32
    return %c0_i32, %arg0 : i32, i32
  }
  func.func @transform_1(%arg0: i32) -> (i32, i32) {
    %c0_i32 = arith.constant 0 : i32
    %c0_i32_0 = arith.constant 0 : i32
    %c0_i32_1 = arith.constant 0 : i32
    return %c0_i32, %c0_i32_0 : i32, i32
  }
  func.func @transform_2(%arg0: i32) -> (i32, i32) {
    %c0_i32 = arith.constant 0 : i32
    %c0_i32_0 = arith.constant 0 : i32
    %c0_i32_1 = arith.constant 0 : i32
    return %c0_i32, %c0_i32_0 : i32, i32
  }
  func.func @transform_3(%arg0: i32) -> (i32, i32) {
    %c0_i32 = arith.constant 0 : i32
    %c0_i32_0 = arith.constant 0 : i32
    %c0_i32_1 = arith.constant 0 : i32
    return %c0_i32, %c0_i32_0 : i32, i32
  }
  func.func @transform_4(%arg0: i32) -> (i32, i32) {
    %c0_i32 = arith.constant 0 : i32
    %c0_i32_0 = arith.constant 0 : i32
    %c0_i32_1 = arith.constant 0 : i32
    return %c0_i32, %c0_i32_0 : i32, i32
  }
  func.func @transform_5(%arg0: i32) -> (i32, i32) {
    %c0_i32 = arith.constant 0 : i32
    %c0_i32_0 = arith.constant 0 : i32
    return %c0_i32, %arg0 : i32, i32
  }
  func.func @transform_6(%arg0: i32) -> (i32, i32) {
    %c0_i32 = arith.constant 0 : i32
    %c0_i32_0 = arith.constant 0 : i32
    return %c0_i32, %arg0 : i32, i32
  }
}

</mosaic_0001>

<bundles_post_ra>
// kernel: basic_mlp_pallas.1
= control target key start
LH: loop header
LB: loop body
LE: loop exit
PB: predicated region body
PF: predicated region fallthrough
CT: control target
= control target key end

     0   :  { %vm67_vm0 = vcmask 1043456   ;;  %vm54_vm1 = vcmask 31744   ;;  %v167_v3 = vmov 0   ;;  %vm119_vm6 = vcmask 261120   ;;  %s249_s0 = inlined_call_operand.vmem [shape: f32[4,16], index: 0, kind: input, shape index: {}]   ;;  %s250_s1 = inlined_call_operand.vmem [shape: f32[32,4], index: 1, kind: input, shape index: {}]   ;;  %s251_s2 = inlined_call_operand.vmem [shape: f32[32,1], index: 2, kind: input, shape index: {}]   ;;  %s252_s4 = inlined_call_operand.vmem [shape: f32[8,1], index: 4, kind: input, shape index: {}]   ;;  %s253_s3 = inlined_call_operand.vmem [shape: f32[8,32], index: 3, kind: input, shape index: {}]   ;;  %s254_s5 = inlined_call_operand.vmem [shape: s8[8,16], index: 5, kind: input, shape index: {}]   ;;  %s255_s6 = inlined_call_operand.vmem [shape: f32[8,16], index: 6, kind: output, shape index: {}]  }
   0x1   :  { %v29_v0 = vld [vmem:[%s249_s0] sm:$0xf]  ;;  %v26_v1 = vld [vmem:[%s250_s1 + $0x8] sm:$0xff]  ;;  %v28_v2 = vld [vmem:[%s250_s1 + $0x18] sm:$0xff]  ;;  %164 = vset.pattern.permute.xlu0 %v167_v3  ;;  %165 = vset.pattern.permute.xlu1 %v167_v3  ;;  %vm149_vm9 = vcmask 130048  }
   0x2   :  { %161 = vmatpush.msk.msra.mxu2 %vm67_vm0, %v29_v0  ;;  %162 = vmatpush.msk.msra.mxu3 %vm67_vm0, %v29_v0  ;;  %v25_v4 = vld [vmem:[%s250_s1] sm:$0xff]  ;;  %v33_v5 = vld [vmem:[%s251_s2 + $0x18] sm:$0xff]  ;;  %v31_v6 = vld [vmem:[%s251_s2 + $0x8] sm:$0xff] }
   0x3   :  { %157 = vmatmul.msk.f32.vlgmr.msra.gmra.mxu2 %vm54_vm1, %v26_v1  ;;  %159 = vmatmul.msk.f32.vlgmr.msra.gmra.mxu3 %vm54_vm1, %v28_v2  ;;  %v27_v7 = vld [vmem:[%s250_s1 + $0x10] sm:$0xff]  ;;  %v30_v9 = vld [vmem:[%s251_s2] sm:$0xff] }
   0x4   :  { %155 = vmatpush.msk.msra.mxu0 %vm67_vm0, %v29_v0  ;;  %51 = vperm.xlu0 %164, %v33_v5   ;;  %v32_v8 = vld [vmem:[%s251_s2 + $0x10] sm:$0xff]  ;;  %v113_v10 = vld [vmem:[%s252_s4] sm:$0xff] }
   0x5   :  { %156 = vmatmul.msk.f32.vlgmr.msra.gmra.mxu0 %vm54_vm1, %v25_v4  ;;  %41 = vperm.xlu1 %165, %v31_v6   ;;  %v112_v30 = vld [vmem:[%s253_s3] sm:$0xff] }
   0x6   :  { %166 = vset.pattern.permute.xlu2 %v167_v3  ;;  %v143_v32 = vld [vmem:[%s254_s5] sm:$0x3] }
   0x7   :  { %116 = vperm.xlu2 %166, %v113_v10   ;;  %vm144_vm7 = vnez %v143_v32 }
   0x8   :  { %v145_v33 = vsel %vm144_vm7, 16843009, %v167_v3 }
   0x9   :  { %v146_v34 = vunpack.c.0.s8 %v145_v33 }
   0xb   :  { %158 = vmatmul.msk.f32.gmra.mxu2 %vm54_vm1, %v27_v7  ;;  %vm147_vm8 = vcmp.ne.s32.totalorder %v146_v34, 0 }
   0xc   :  { %46 = vperm.xlu0 %164, %v32_v8  }
   0xd   :  { %36 = vperm.xlu1 %165, %v30_v9  }
  0x61   :  { %v117_v35 = vpop.permute.xlu2 %116 }
  0x76   :  { %v52_v12 = vpop.permute.xlu0 %51 }
  0x77   :  { %v42_v11 = vpop.permute.xlu1 %41 }
  0x7e   :  { %v47_v21 = vpop.permute.xlu0 %46 }
  0x7f   :  { %v37_v18 = vpop.permute.xlu1 %36 }
  0x82   :  { %v88_v19 = vpop.f32.mrf.mxu0 }
  0x83   :  { %v89_v23 = vadd.f32 %v88_v19, %v37_v18 }
  0x85   :  { %v104_v28 = vmul.f32 0.01, %v89_v23  ;;  %vm100_vm5 = vcmp.ge.f32.partialorder %v89_v23, 0.0 }
  0x86   :  { %v91_v13 = vpop.f32.mrf.mxu2  ;;  %v97_v14 = vpop.f32.mrf.mxu3 }
  0x87   :  { %v98_v15 = vadd.f32 %v97_v14, %v52_v12  ;;  %v92_v20 = vadd.f32 %v91_v13, %v42_v11  ;;  %v108_v31 = vsel %vm100_vm5, %v89_v23, %v104_v28 }
  0x89   :  { %vm103_vm2 = vcmp.ge.f32.partialorder %v98_v15, 0.0  ;;  %v107_v16 = vmul.f32 0.01, %v98_v15  ;;  %v105_v26 = vmul.f32 0.01, %v92_v20  ;;  %vm101_vm4 = vcmp.ge.f32.partialorder %v92_v20, 0.0 }
  0x8b   :  { %v111_v17 = vsel %vm103_vm2, %v98_v15, %v107_v16  ;;  %v109_v29 = vsel %vm101_vm4, %v92_v20, %v105_v26 }
  0x8c   :  { %135 = vmatpush.msra.mxu1 %v111_v17 }
  0x8e   :  { %v94_v22 = vpop.f32.mrf.mxu2 }
  0x8f   :  { %v95_v24 = vadd.f32 %v94_v22, %v47_v21 }
  0x91   :  { %vm102_vm3 = vcmp.ge.f32.partialorder %v95_v24, 0.0  ;;  %v106_v25 = vmul.f32 0.01, %v95_v24 }
  0x93   :  { %v110_v27 = vsel %vm102_vm3, %v95_v24, %v106_v25 }
  0x94   :  { %136 = vmatpush.msra.mxu1 %v110_v27 }
  0x96   :  { %137 = vmatpush.msra.mxu1 %v109_v29 }
  0x98   :  { %138 = vmatpush.msra.mxu1 %v108_v31 }
  0x99   :  { %160 = vmatmul.msk.f32.vlgmr.msra.gmra.mxu1 %vm119_vm6, %v112_v30 }
 0x116   :  { %v140_v36 = vpop.f32.mrf.mxu1 }
 0x117   :  { %v141_v37 = vadd.f32 %v140_v36, %v117_v35 }
 0x119   :  { %v148_v38 = vsel %vm147_vm8, %v141_v37, 0.0 }
 0x11a   :  { %150 = vst.msk [vmem:[%s255_s6] sm:$0xff] %vm149_vm9, %v148_v38 }

</bundles_post_ra>
